<compile_context>
chip_gen: v5e
topology: v5e:2x2
jax: 0.10.0
libtpu: 0.0.40
codegen_flags: <defaults>
</compile_context>

<pallas_src>
import functools

import jax
import jax.numpy as jnp
from jax.experimental import pallas as pl
from jax.experimental.pallas import tpu as pltpu

HIDDEN = 32
LANES = 1024        # lane-dense last dim (multiple of 128)
TILE_ROWS = 256     # sublane rows per grid step: 256*1024*4 B = 1 MiB tile
CHUNK_ROWS = 8      # in-kernel row chunk kept resident in vregs (one vreg row-set)


def _mlp_kernel(x_ref, w1_ref, b1_ref, w2_ref, b2_ref, o_ref, *, compute_dtype):
    # x_ref : (rows, lanes) f32, VMEM -- batch elements live on lanes.
    # w1_ref, b1_ref, w2_ref : (32,) f32, SMEM ; b2_ref : (1,) f32, SMEM.
    # o_ref : (rows, lanes) f32, VMEM.
    rows = x_ref.shape[0]            # static (block shape)
    chunk = min(CHUNK_ROWS, rows)    # rows is a multiple of 8, chunk divides it
    n_chunks = rows // chunk

    # Hoist the 66 SMEM scalar loads (and casts) out of the row-chunk loop.
    w1 = [w1_ref[j].astype(compute_dtype) for j in range(HIDDEN)]
    b1 = [b1_ref[j].astype(compute_dtype) for j in range(HIDDEN)]
    w2 = [w2_ref[j].astype(compute_dtype) for j in range(HIDDEN)]
    b2 = b2_ref[0].astype(compute_dtype)

    @pl.loop(0, n_chunks)
    def _(c):
        r = pl.multiple_of(c * chunk, chunk)          # sublane-aligned offset
        x = x_ref[pl.ds(r, chunk), :].astype(compute_dtype)
        # j = 0: fold b2 into the accumulator, skip the zeros init.
        h = jnp.maximum(x * w1[0] + b1[0], 0.0)
        acc = h * w2[0] + b2
        # Static unroll over the remaining hidden units: pure scalar*vector
        # VPU work on vreg-resident data. No MXU, no cross-lane traffic.
        for j in range(1, HIDDEN):
            h = jnp.maximum(x * w1[j] + b1[j], 0.0)
            acc = acc + h * w2[j]
        o_ref[pl.ds(r, chunk), :] = acc.astype(o_ref.dtype)


def simple_controller_forward(x, w1, b1, w2, b2, *, lanes=LANES,
                              tile_rows=TILE_ROWS,
                              compute_dtype=jnp.float32):
    """x: (B, 1) float32 -> (B, 1) float32 (same math as the PyTorch module).

    Weights stored as (in, out): w1 (1, 32), b1 (32,), w2 (32, 1), b2 (1,).
    """
    B = x.shape[0]
    # Shrink the slab for small batches so padding stays small.
    lanes = min(lanes, 128 * pl.cdiv(max(B, 1), 128))
    rows_needed = 8 * pl.cdiv(pl.cdiv(max(B, 1), lanes), 8)
    tile_rows = min(tile_rows, rows_needed)
    n_tiles = pl.cdiv(rows_needed, tile_rows)
    total_rows = n_tiles * tile_rows
    padded = total_rows * lanes

    # Wrapper-side layout plumbing: batch -> lane-dense 2-D slab. The pad /
    # final slice HBM passes are skipped when B already fills the slab.
    xf = x.reshape(-1).astype(jnp.float32)
    if padded != B:
        xf = jnp.pad(xf, (0, padded - B))
    xs = xf.reshape(total_rows, lanes)

    smem_spec = pl.BlockSpec(memory_space=pltpu.MemorySpace.SMEM)
    kernel = functools.partial(_mlp_kernel, compute_dtype=compute_dtype)
    out = pl.pallas_call(
        kernel,
        out_shape=jax.ShapeDtypeStruct((total_rows, lanes), jnp.float32),
        grid=(n_tiles,),
        in_specs=[
            pl.BlockSpec((tile_rows, lanes), lambda i: (i, 0)),  # x batch tile
            smem_spec,  # w1 scalars
            smem_spec,  # b1 scalars
            smem_spec,  # w2 scalars
            smem_spec,  # b2 scalar
        ],
        out_specs=pl.BlockSpec((tile_rows, lanes), lambda i: (i, 0)),
        compiler_params=pltpu.CompilerParams(
            dimension_semantics=("parallel",)),
        cost_estimate=pl.CostEstimate(
            flops=161 * padded, transcendentals=0, bytes_accessed=8 * padded),
    )(
        xs,
        w1.reshape(-1).astype(jnp.float32),
        b1.reshape(-1).astype(jnp.float32),
        w2.reshape(-1).astype(jnp.float32),
        b2.reshape(-1).astype(jnp.float32),
    )
    if padded == B:
        return out.reshape(B, 1)
    return out.reshape(-1)[:B].reshape(B, 1)


def init_params(key):
    """Deterministic init matching the PyTorch module's parameter shapes.

    PyTorch shapes:  net[0].weight (32, 1), net[0].bias (32,)
                     net[2].weight (1, 32), net[2].bias (1,)
    Stored here as (in, out) for the wrapper.
    """
    k1, k2, k3, k4 = jax.random.split(key, 4)
    bound1 = 1.0 / jnp.sqrt(1.0)
    bound2 = 1.0 / jnp.sqrt(float(HIDDEN))
    w1 = jax.random.uniform(k1, (1, HIDDEN), jnp.float32, -bound1, bound1)
    b1 = jax.random.uniform(k2, (HIDDEN,), jnp.float32, -bound1, bound1)
    w2 = jax.random.uniform(k3, (HIDDEN, 1), jnp.float32, -bound2, bound2)
    b2 = jax.random.uniform(k4, (1,), jnp.float32, -bound2, bound2)
    return w1, b1, w2, b2


if __name__ == "__main__":
    key = jax.random.PRNGKey(0)
    kx, kp = jax.random.split(key)

    B = 8
    x = jax.random.normal(kx, (B, 1), jnp.float32)
    w1, b1, w2, b2 = init_params(kp)

    out = simple_controller_forward(x, w1, b1, w2, b2)
    out = jax.block_until_ready(out)

    # Reference check in plain JAX (same math as the PyTorch module).
    ref = jnp.maximum(x @ w1 + b1[None, :], 0.0) @ w2 + b2[None, :]
    assert out.shape == (B, 1)
    assert jnp.allclose(out, ref, atol=1e-5, rtol=1e-5)

    print("KERNEL_OK")
</pallas_src>

<mosaic_0001>
module attributes {stable_mosaic.version = 11 : i64} {
  func.func @_mlp_kernel(%arg0: i32, %arg1: memref<8x128xf32, #tpu.memory_space<vmem>>, %arg2: memref<32xf32, #tpu.memory_space<smem>>, %arg3: memref<32xf32, #tpu.memory_space<smem>>, %arg4: memref<32xf32, #tpu.memory_space<smem>>, %arg5: memref<1xf32, #tpu.memory_space<smem>>, %arg6: memref<8x128xf32, #tpu.memory_space<vmem>>) attributes {dimension_semantics = [#tpu.dimension_semantics<parallel>], iteration_bounds = array<i64: 1>, scalar_prefetch = 0 : i64, scratch_operands = 0 : i64, tpu.core_type = #tpu.core_type<tc>, window_params = [{transform_indices = @transform_0, window_bounds = array<i64: 8, 128>}, {transform_indices = @transform_1, window_bounds = array<i64: 32>}, {transform_indices = @transform_2, window_bounds = array<i64: 32>}, {transform_indices = @transform_3, window_bounds = array<i64: 32>}, {transform_indices = @transform_4, window_bounds = array<i64: 1>}, {transform_indices = @transform_5, window_bounds = array<i64: 8, 128>}]} {
    %c0 = arith.constant 0 : index
    %0 = memref.load %arg2[%c0] : memref<32xf32, #tpu.memory_space<smem>>
    %c1 = arith.constant 1 : index
    %1 = memref.load %arg2[%c1] : memref<32xf32, #tpu.memory_space<smem>>
    %c2 = arith.constant 2 : index
    %2 = memref.load %arg2[%c2] : memref<32xf32, #tpu.memory_space<smem>>
    %c3 = arith.constant 3 : index
    %3 = memref.load %arg2[%c3] : memref<32xf32, #tpu.memory_space<smem>>
    %c4 = arith.constant 4 : index
    %4 = memref.load %arg2[%c4] : memref<32xf32, #tpu.memory_space<smem>>
    %c5 = arith.constant 5 : index
    %5 = memref.load %arg2[%c5] : memref<32xf32, #tpu.memory_space<smem>>
    %c6 = arith.constant 6 : index
    %6 = memref.load %arg2[%c6] : memref<32xf32, #tpu.memory_space<smem>>
    %c7 = arith.constant 7 : index
    %7 = memref.load %arg2[%c7] : memref<32xf32, #tpu.memory_space<smem>>
    %c8 = arith.constant 8 : index
    %8 = memref.load %arg2[%c8] : memref<32xf32, #tpu.memory_space<smem>>
    %c9 = arith.constant 9 : index
    %9 = memref.load %arg2[%c9] : memref<32xf32, #tpu.memory_space<smem>>
    %c10 = arith.constant 10 : index
    %10 = memref.load %arg2[%c10] : memref<32xf32, #tpu.memory_space<smem>>
    %c11 = arith.constant 11 : index
    %11 = memref.load %arg2[%c11] : memref<32xf32, #tpu.memory_space<smem>>
    %c12 = arith.constant 12 : index
    %12 = memref.load %arg2[%c12] : memref<32xf32, #tpu.memory_space<smem>>
    %c13 = arith.constant 13 : index
    %13 = memref.load %arg2[%c13] : memref<32xf32, #tpu.memory_space<smem>>
    %c14 = arith.constant 14 : index
    %14 = memref.load %arg2[%c14] : memref<32xf32, #tpu.memory_space<smem>>
    %c15 = arith.constant 15 : index
    %15 = memref.load %arg2[%c15] : memref<32xf32, #tpu.memory_space<smem>>
    %c16 = arith.constant 16 : index
    %16 = memref.load %arg2[%c16] : memref<32xf32, #tpu.memory_space<smem>>
    %c17 = arith.constant 17 : index
    %17 = memref.load %arg2[%c17] : memref<32xf32, #tpu.memory_space<smem>>
    %c18 = arith.constant 18 : index
    %18 = memref.load %arg2[%c18] : memref<32xf32, #tpu.memory_space<smem>>
    %c19 = arith.constant 19 : index
    %19 = memref.load %arg2[%c19] : memref<32xf32, #tpu.memory_space<smem>>
    %c20 = arith.constant 20 : index
    %20 = memref.load %arg2[%c20] : memref<32xf32, #tpu.memory_space<smem>>
    %c21 = arith.constant 21 : index
    %21 = memref.load %arg2[%c21] : memref<32xf32, #tpu.memory_space<smem>>
    %c22 = arith.constant 22 : index
    %22 = memref.load %arg2[%c22] : memref<32xf32, #tpu.memory_space<smem>>
    %c23 = arith.constant 23 : index
    %23 = memref.load %arg2[%c23] : memref<32xf32, #tpu.memory_space<smem>>
    %c24 = arith.constant 24 : index
    %24 = memref.load %arg2[%c24] : memref<32xf32, #tpu.memory_space<smem>>
    %c25 = arith.constant 25 : index
    %25 = memref.load %arg2[%c25] : memref<32xf32, #tpu.memory_space<smem>>
    %c26 = arith.constant 26 : index
    %26 = memref.load %arg2[%c26] : memref<32xf32, #tpu.memory_space<smem>>
    %c27 = arith.constant 27 : index
    %27 = memref.load %arg2[%c27] : memref<32xf32, #tpu.memory_space<smem>>
    %c28 = arith.constant 28 : index
    %28 = memref.load %arg2[%c28] : memref<32xf32, #tpu.memory_space<smem>>
    %c29 = arith.constant 29 : index
    %29 = memref.load %arg2[%c29] : memref<32xf32, #tpu.memory_space<smem>>
    %c30 = arith.constant 30 : index
    %30 = memref.load %arg2[%c30] : memref<32xf32, #tpu.memory_space<smem>>
    %c31 = arith.constant 31 : index
    %31 = memref.load %arg2[%c31] : memref<32xf32, #tpu.memory_space<smem>>
    %c0_0 = arith.constant 0 : index
    %32 = memref.load %arg3[%c0_0] : memref<32xf32, #tpu.memory_space<smem>>
    %c1_1 = arith.constant 1 : index
    %33 = memref.load %arg3[%c1_1] : memref<32xf32, #tpu.memory_space<smem>>
    %c2_2 = arith.constant 2 : index
    %34 = memref.load %arg3[%c2_2] : memref<32xf32, #tpu.memory_space<smem>>
    %c3_3 = arith.constant 3 : index
    %35 = memref.load %arg3[%c3_3] : memref<32xf32, #tpu.memory_space<smem>>
    %c4_4 = arith.constant 4 : index
    %36 = memref.load %arg3[%c4_4] : memref<32xf32, #tpu.memory_space<smem>>
    %c5_5 = arith.constant 5 : index
    %37 = memref.load %arg3[%c5_5] : memref<32xf32, #tpu.memory_space<smem>>
    %c6_6 = arith.constant 6 : index
    %38 = memref.load %arg3[%c6_6] : memref<32xf32, #tpu.memory_space<smem>>
    %c7_7 = arith.constant 7 : index
    %39 = memref.load %arg3[%c7_7] : memref<32xf32, #tpu.memory_space<smem>>
    %c8_8 = arith.constant 8 : index
    %40 = memref.load %arg3[%c8_8] : memref<32xf32, #tpu.memory_space<smem>>
    %c9_9 = arith.constant 9 : index
    %41 = memref.load %arg3[%c9_9] : memref<32xf32, #tpu.memory_space<smem>>
    %c10_10 = arith.constant 10 : index
    %42 = memref.load %arg3[%c10_10] : memref<32xf32, #tpu.memory_space<smem>>
    %c11_11 = arith.constant 11 : index
    %43 = memref.load %arg3[%c11_11] : memref<32xf32, #tpu.memory_space<smem>>
    %c12_12 = arith.constant 12 : index
    %44 = memref.load %arg3[%c12_12] : memref<32xf32, #tpu.memory_space<smem>>
    %c13_13 = arith.constant 13 : index
    %45 = memref.load %arg3[%c13_13] : memref<32xf32, #tpu.memory_space<smem>>
    %c14_14 = arith.constant 14 : index
    %46 = memref.load %arg3[%c14_14] : memref<32xf32, #tpu.memory_space<smem>>
    %c15_15 = arith.constant 15 : index
    %47 = memref.load %arg3[%c15_15] : memref<32xf32, #tpu.memory_space<smem>>
    %c16_16 = arith.constant 16 : index
    %48 = memref.load %arg3[%c16_16] : memref<32xf32, #tpu.memory_space<smem>>
    %c17_17 = arith.constant 17 : index
    %49 = memref.load %arg3[%c17_17] : memref<32xf32, #tpu.memory_space<smem>>
    %c18_18 = arith.constant 18 : index
    %50 = memref.load %arg3[%c18_18] : memref<32xf32, #tpu.memory_space<smem>>
    %c19_19 = arith.constant 19 : index
    %51 = memref.load %arg3[%c19_19] : memref<32xf32, #tpu.memory_space<smem>>
    %c20_20 = arith.constant 20 : index
    %52 = memref.load %arg3[%c20_20] : memref<32xf32, #tpu.memory_space<smem>>
    %c21_21 = arith.constant 21 : index
    %53 = memref.load %arg3[%c21_21] : memref<32xf32, #tpu.memory_space<smem>>
    %c22_22 = arith.constant 22 : index
    %54 = memref.load %arg3[%c22_22] : memref<32xf32, #tpu.memory_space<smem>>
    %c23_23 = arith.constant 23 : index
    %55 = memref.load %arg3[%c23_23] : memref<32xf32, #tpu.memory_space<smem>>
    %c24_24 = arith.constant 24 : index
    %56 = memref.load %arg3[%c24_24] : memref<32xf32, #tpu.memory_space<smem>>
    %c25_25 = arith.constant 25 : index
    %57 = memref.load %arg3[%c25_25] : memref<32xf32, #tpu.memory_space<smem>>
    %c26_26 = arith.constant 26 : index
    %58 = memref.load %arg3[%c26_26] : memref<32xf32, #tpu.memory_space<smem>>
    %c27_27 = arith.constant 27 : index
    %59 = memref.load %arg3[%c27_27] : memref<32xf32, #tpu.memory_space<smem>>
    %c28_28 = arith.constant 28 : index
    %60 = memref.load %arg3[%c28_28] : memref<32xf32, #tpu.memory_space<smem>>
    %c29_29 = arith.constant 29 : index
    %61 = memref.load %arg3[%c29_29] : memref<32xf32, #tpu.memory_space<smem>>
    %c30_30 = arith.constant 30 : index
    %62 = memref.load %arg3[%c30_30] : memref<32xf32, #tpu.memory_space<smem>>
    %c31_31 = arith.constant 31 : index
    %63 = memref.load %arg3[%c31_31] : memref<32xf32, #tpu.memory_space<smem>>
    %c0_32 = arith.constant 0 : index
    %64 = memref.load %arg4[%c0_32] : memref<32xf32, #tpu.memory_space<smem>>
    %c1_33 = arith.constant 1 : index
    %65 = memref.load %arg4[%c1_33] : memref<32xf32, #tpu.memory_space<smem>>
    %c2_34 = arith.constant 2 : index
    %66 = memref.load %arg4[%c2_34] : memref<32xf32, #tpu.memory_space<smem>>
    %c3_35 = arith.constant 3 : index
    %67 = memref.load %arg4[%c3_35] : memref<32xf32, #tpu.memory_space<smem>>
    %c4_36 = arith.constant 4 : index
    %68 = memref.load %arg4[%c4_36] : memref<32xf32, #tpu.memory_space<smem>>
    %c5_37 = arith.constant 5 : index
    %69 = memref.load %arg4[%c5_37] : memref<32xf32, #tpu.memory_space<smem>>
    %c6_38 = arith.constant 6 : index
    %70 = memref.load %arg4[%c6_38] : memref<32xf32, #tpu.memory_space<smem>>
    %c7_39 = arith.constant 7 : index
    %71 = memref.load %arg4[%c7_39] : memref<32xf32, #tpu.memory_space<smem>>
    %c8_40 = arith.constant 8 : index
    %72 = memref.load %arg4[%c8_40] : memref<32xf32, #tpu.memory_space<smem>>
    %c9_41 = arith.constant 9 : index
    %73 = memref.load %arg4[%c9_41] : memref<32xf32, #tpu.memory_space<smem>>
    %c10_42 = arith.constant 10 : index
    %74 = memref.load %arg4[%c10_42] : memref<32xf32, #tpu.memory_space<smem>>
    %c11_43 = arith.constant 11 : index
    %75 = memref.load %arg4[%c11_43] : memref<32xf32, #tpu.memory_space<smem>>
    %c12_44 = arith.constant 12 : index
    %76 = memref.load %arg4[%c12_44] : memref<32xf32, #tpu.memory_space<smem>>
    %c13_45 = arith.constant 13 : index
    %77 = memref.load %arg4[%c13_45] : memref<32xf32, #tpu.memory_space<smem>>
    %c14_46 = arith.constant 14 : index
    %78 = memref.load %arg4[%c14_46] : memref<32xf32, #tpu.memory_space<smem>>
    %c15_47 = arith.constant 15 : index
    %79 = memref.load %arg4[%c15_47] : memref<32xf32, #tpu.memory_space<smem>>
    %c16_48 = arith.constant 16 : index
    %80 = memref.load %arg4[%c16_48] : memref<32xf32, #tpu.memory_space<smem>>
    %c17_49 = arith.constant 17 : index
    %81 = memref.load %arg4[%c17_49] : memref<32xf32, #tpu.memory_space<smem>>
    %c18_50 = arith.constant 18 : index
    %82 = memref.load %arg4[%c18_50] : memref<32xf32, #tpu.memory_space<smem>>
    %c19_51 = arith.constant 19 : index
    %83 = memref.load %arg4[%c19_51] : memref<32xf32, #tpu.memory_space<smem>>
    %c20_52 = arith.constant 20 : index
    %84 = memref.load %arg4[%c20_52] : memref<32xf32, #tpu.memory_space<smem>>
    %c21_53 = arith.constant 21 : index
    %85 = memref.load %arg4[%c21_53] : memref<32xf32, #tpu.memory_space<smem>>
    %c22_54 = arith.constant 22 : index
    %86 = memref.load %arg4[%c22_54] : memref<32xf32, #tpu.memory_space<smem>>
    %c23_55 = arith.constant 23 : index
    %87 = memref.load %arg4[%c23_55] : memref<32xf32, #tpu.memory_space<smem>>
    %c24_56 = arith.constant 24 : index
    %88 = memref.load %arg4[%c24_56] : memref<32xf32, #tpu.memory_space<smem>>
    %c25_57 = arith.constant 25 : index
    %89 = memref.load %arg4[%c25_57] : memref<32xf32, #tpu.memory_space<smem>>
    %c26_58 = arith.constant 26 : index
    %90 = memref.load %arg4[%c26_58] : memref<32xf32, #tpu.memory_space<smem>>
    %c27_59 = arith.constant 27 : index
    %91 = memref.load %arg4[%c27_59] : memref<32xf32, #tpu.memory_space<smem>>
    %c28_60 = arith.constant 28 : index
    %92 = memref.load %arg4[%c28_60] : memref<32xf32, #tpu.memory_space<smem>>
    %c29_61 = arith.constant 29 : index
    %93 = memref.load %arg4[%c29_61] : memref<32xf32, #tpu.memory_space<smem>>
    %c30_62 = arith.constant 30 : index
    %94 = memref.load %arg4[%c30_62] : memref<32xf32, #tpu.memory_space<smem>>
    %c31_63 = arith.constant 31 : index
    %95 = memref.load %arg4[%c31_63] : memref<32xf32, #tpu.memory_space<smem>>
    %c0_64 = arith.constant 0 : index
    %96 = memref.load %arg5[%c0_64] : memref<1xf32, #tpu.memory_space<smem>>
    %c0_i32 = arith.constant 0 : i32
    %c1_i32 = arith.constant 1 : i32
    %97 = arith.muli %c0_i32, %c1_i32 : i32
    %c0_i32_65 = arith.constant 0 : i32
    %98 = arith.addi %c0_i32_65, %97 : i32
    %c8_i32 = arith.constant 8 : i32
    %99 = arith.muli %98, %c8_i32 : i32
    %100 = tpu.assume_multiple %99, 8 : i32
    %101 = arith.index_cast %100 : i32 to index
    %c0_66 = arith.constant 0 : index
    %102 = vector.load %arg1[%101, %c0_66] : memref<8x128xf32, #tpu.memory_space<vmem>>, vector<8x128xf32>
    %103 = vector.broadcast %0 : f32 to vector<8x128xf32>
    %104 = arith.mulf %102, %103 : vector<8x128xf32>
    %105 = vector.broadcast %32 : f32 to vector<8x128xf32>
    %106 = arith.addf %104, %105 : vector<8x128xf32>
    %cst = arith.constant 0.000000e+00 : f32
    %107 = vector.broadcast %cst : f32 to vector<8x128xf32>
    %108 = arith.maximumf %106, %107 : vector<8x128xf32>
    %109 = vector.broadcast %64 : f32 to vector<8x128xf32>
    %110 = arith.mulf %108, %109 : vector<8x128xf32>
    %111 = vector.broadcast %96 : f32 to vector<8x128xf32>
    %112 = arith.addf %110, %111 : vector<8x128xf32>
    %113 = vector.broadcast %1 : f32 to vector<8x128xf32>
    %114 = arith.mulf %102, %113 : vector<8x128xf32>
    %115 = vector.broadcast %33 : f32 to vector<8x128xf32>
    %116 = arith.addf %114, %115 : vector<8x128xf32>
    %cst_67 = arith.constant 0.000000e+00 : f32
    %117 = vector.broadcast %cst_67 : f32 to vector<8x128xf32>
    %118 = arith.maximumf %116, %117 : vector<8x128xf32>
    %119 = vector.broadcast %65 : f32 to vector<8x128xf32>
    %120 = arith.mulf %118, %119 : vector<8x128xf32>
    %121 = arith.addf %112, %120 : vector<8x128xf32>
    %122 = vector.broadcast %2 : f32 to vector<8x128xf32>
    %123 = arith.mulf %102, %122 : vector<8x128xf32>
    %124 = vector.broadcast %34 : f32 to vector<8x128xf32>
    %125 = arith.addf %123, %124 : vector<8x128xf32>
    %cst_68 = arith.constant 0.000000e+00 : f32
    %126 = vector.broadcast %cst_68 : f32 to vector<8x128xf32>
    %127 = arith.maximumf %125, %126 : vector<8x128xf32>
    %128 = vector.broadcast %66 : f32 to vector<8x128xf32>
    %129 = arith.mulf %127, %128 : vector<8x128xf32>
    %130 = arith.addf %121, %129 : vector<8x128xf32>
    %131 = vector.broadcast %3 : f32 to vector<8x128xf32>
    %132 = arith.mulf %102, %131 : vector<8x128xf32>
    %133 = vector.broadcast %35 : f32 to vector<8x128xf32>
    %134 = arith.addf %132, %133 : vector<8x128xf32>
    %cst_69 = arith.constant 0.000000e+00 : f32
    %135 = vector.broadcast %cst_69 : f32 to vector<8x128xf32>
    %136 = arith.maximumf %134, %135 : vector<8x128xf32>
    %137 = vector.broadcast %67 : f32 to vector<8x128xf32>
    %138 = arith.mulf %136, %137 : vector<8x128xf32>
    %139 = arith.addf %130, %138 : vector<8x128xf32>
    %140 = vector.broadcast %4 : f32 to vector<8x128xf32>
    %141 = arith.mulf %102, %140 : vector<8x128xf32>
    %142 = vector.broadcast %36 : f32 to vector<8x128xf32>
    %143 = arith.addf %141, %142 : vector<8x128xf32>
    %cst_70 = arith.constant 0.000000e+00 : f32
    %144 = vector.broadcast %cst_70 : f32 to vector<8x128xf32>
    %145 = arith.maximumf %143, %144 : vector<8x128xf32>
    %146 = vector.broadcast %68 : f32 to vector<8x128xf32>
    %147 = arith.mulf %145, %146 : vector<8x128xf32>
    %148 = arith.addf %139, %147 : vector<8x128xf32>
    %149 = vector.broadcast %5 : f32 to vector<8x128xf32>
    %150 = arith.mulf %102, %149 : vector<8x128xf32>
    %151 = vector.broadcast %37 : f32 to vector<8x128xf32>
    %152 = arith.addf %150, %151 : vector<8x128xf32>
    %cst_71 = arith.constant 0.000000e+00 : f32
    %153 = vector.broadcast %cst_71 : f32 to vector<8x128xf32>
    %154 = arith.maximumf %152, %153 : vector<8x128xf32>
    %155 = vector.broadcast %69 : f32 to vector<8x128xf32>
    %156 = arith.mulf %154, %155 : vector<8x128xf32>
    %157 = arith.addf %148, %156 : vector<8x128xf32>
    %158 = vector.broadcast %6 : f32 to vector<8x128xf32>
    %159 = arith.mulf %102, %158 : vector<8x128xf32>
    %160 = vector.broadcast %38 : f32 to vector<8x128xf32>
    %161 = arith.addf %159, %160 : vector<8x128xf32>
    %cst_72 = arith.constant 0.000000e+00 : f32
    %162 = vector.broadcast %cst_72 : f32 to vector<8x128xf32>
    %163 = arith.maximumf %161, %162 : vector<8x128xf32>
    %164 = vector.broadcast %70 : f32 to vector<8x128xf32>
    %165 = arith.mulf %163, %164 : vector<8x128xf32>
    %166 = arith.addf %157, %165 : vector<8x128xf32>
    %167 = vector.broadcast %7 : f32 to vector<8x128xf32>
    %168 = arith.mulf %102, %167 : vector<8x128xf32>
    %169 = vector.broadcast %39 : f32 to vector<8x128xf32>
    %170 = arith.addf %168, %169 : vector<8x128xf32>
    %cst_73 = arith.constant 0.000000e+00 : f32
    %171 = vector.broadcast %cst_73 : f32 to vector<8x128xf32>
    %172 = arith.maximumf %170, %171 : vector<8x128xf32>
    %173 = vector.broadcast %71 : f32 to vector<8x128xf32>
    %174 = arith.mulf %172, %173 : vector<8x128xf32>
    %175 = arith.addf %166, %174 : vector<8x128xf32>
    %176 = vector.broadcast %8 : f32 to vector<8x128xf32>
    %177 = arith.mulf %102, %176 : vector<8x128xf32>
    %178 = vector.broadcast %40 : f32 to vector<8x128xf32>
    %179 = arith.addf %177, %178 : vector<8x128xf32>
    %cst_74 = arith.constant 0.000000e+00 : f32
    %180 = vector.broadcast %cst_74 : f32 to vector<8x128xf32>
    %181 = arith.maximumf %179, %180 : vector<8x128xf32>
    %182 = vector.broadcast %72 : f32 to vector<8x128xf32>
    %183 = arith.mulf %181, %182 : vector<8x128xf32>
    %184 = arith.addf %175, %183 : vector<8x128xf32>
    %185 = vector.broadcast %9 : f32 to vector<8x128xf32>
    %186 = arith.mulf %102, %185 : vector<8x128xf32>
    %187 = vector.broadcast %41 : f32 to vector<8x128xf32>
    %188 = arith.addf %186, %187 : vector<8x128xf32>
    %cst_75 = arith.constant 0.000000e+00 : f32
    %189 = vector.broadcast %cst_75 : f32 to vector<8x128xf32>
    %190 = arith.maximumf %188, %189 : vector<8x128xf32>
    %191 = vector.broadcast %73 : f32 to vector<8x128xf32>
    %192 = arith.mulf %190, %191 : vector<8x128xf32>
    %193 = arith.addf %184, %192 : vector<8x128xf32>
    %194 = vector.broadcast %10 : f32 to vector<8x128xf32>
    %195 = arith.mulf %102, %194 : vector<8x128xf32>
    %196 = vector.broadcast %42 : f32 to vector<8x128xf32>
    %197 = arith.addf %195, %196 : vector<8x128xf32>
    %cst_76 = arith.constant 0.000000e+00 : f32
    %198 = vector.broadcast %cst_76 : f32 to vector<8x128xf32>
    %199 = arith.maximumf %197, %198 : vector<8x128xf32>
    %200 = vector.broadcast %74 : f32 to vector<8x128xf32>
    %201 = arith.mulf %199, %200 : vector<8x128xf32>
    %202 = arith.addf %193, %201 : vector<8x128xf32>
    %203 = vector.broadcast %11 : f32 to vector<8x128xf32>
    %204 = arith.mulf %102, %203 : vector<8x128xf32>
    %205 = vector.broadcast %43 : f32 to vector<8x128xf32>
    %206 = arith.addf %204, %205 : vector<8x128xf32>
    %cst_77 = arith.constant 0.000000e+00 : f32
    %207 = vector.broadcast %cst_77 : f32 to vector<8x128xf32>
    %208 = arith.maximumf %206, %207 : vector<8x128xf32>
    %209 = vector.broadcast %75 : f32 to vector<8x128xf32>
    %210 = arith.mulf %208, %209 : vector<8x128xf32>
    %211 = arith.addf %202, %210 : vector<8x128xf32>
    %212 = vector.broadcast %12 : f32 to vector<8x128xf32>
    %213 = arith.mulf %102, %212 : vector<8x128xf32>
    %214 = vector.broadcast %44 : f32 to vector<8x128xf32>
    %215 = arith.addf %213, %214 : vector<8x128xf32>
    %cst_78 = arith.constant 0.000000e+00 : f32
    %216 = vector.broadcast %cst_78 : f32 to vector<8x128xf32>
    %217 = arith.maximumf %215, %216 : vector<8x128xf32>
    %218 = vector.broadcast %76 : f32 to vector<8x128xf32>
    %219 = arith.mulf %217, %218 : vector<8x128xf32>
    %220 = arith.addf %211, %219 : vector<8x128xf32>
    %221 = vector.broadcast %13 : f32 to vector<8x128xf32>
    %222 = arith.mulf %102, %221 : vector<8x128xf32>
    %223 = vector.broadcast %45 : f32 to vector<8x128xf32>
    %224 = arith.addf %222, %223 : vector<8x128xf32>
    %cst_79 = arith.constant 0.000000e+00 : f32
    %225 = vector.broadcast %cst_79 : f32 to vector<8x128xf32>
    %226 = arith.maximumf %224, %225 : vector<8x128xf32>
    %227 = vector.broadcast %77 : f32 to vector<8x128xf32>
    %228 = arith.mulf %226, %227 : vector<8x128xf32>
    %229 = arith.addf %220, %228 : vector<8x128xf32>
    %230 = vector.broadcast %14 : f32 to vector<8x128xf32>
    %231 = arith.mulf %102, %230 : vector<8x128xf32>
    %232 = vector.broadcast %46 : f32 to vector<8x128xf32>
    %233 = arith.addf %231, %232 : vector<8x128xf32>
    %cst_80 = arith.constant 0.000000e+00 : f32
    %234 = vector.broadcast %cst_80 : f32 to vector<8x128xf32>
    %235 = arith.maximumf %233, %234 : vector<8x128xf32>
    %236 = vector.broadcast %78 : f32 to vector<8x128xf32>
    %237 = arith.mulf %235, %236 : vector<8x128xf32>
    %238 = arith.addf %229, %237 : vector<8x128xf32>
    %239 = vector.broadcast %15 : f32 to vector<8x128xf32>
    %240 = arith.mulf %102, %239 : vector<8x128xf32>
    %241 = vector.broadcast %47 : f32 to vector<8x128xf32>
    %242 = arith.addf %240, %241 : vector<8x128xf32>
    %cst_81 = arith.constant 0.000000e+00 : f32
    %243 = vector.broadcast %cst_81 : f32 to vector<8x128xf32>
    %244 = arith.maximumf %242, %243 : vector<8x128xf32>
    %245 = vector.broadcast %79 : f32 to vector<8x128xf32>
    %246 = arith.mulf %244, %245 : vector<8x128xf32>
    %247 = arith.addf %238, %246 : vector<8x128xf32>
    %248 = vector.broadcast %16 : f32 to vector<8x128xf32>
    %249 = arith.mulf %102, %248 : vector<8x128xf32>
    %250 = vector.broadcast %48 : f32 to vector<8x128xf32>
    %251 = arith.addf %249, %250 : vector<8x128xf32>
    %cst_82 = arith.constant 0.000000e+00 : f32
    %252 = vector.broadcast %cst_82 : f32 to vector<8x128xf32>
    %253 = arith.maximumf %251, %252 : vector<8x128xf32>
    %254 = vector.broadcast %80 : f32 to vector<8x128xf32>
    %255 = arith.mulf %253, %254 : vector<8x128xf32>
    %256 = arith.addf %247, %255 : vector<8x128xf32>
    %257 = vector.broadcast %17 : f32 to vector<8x128xf32>
    %258 = arith.mulf %102, %257 : vector<8x128xf32>
    %259 = vector.broadcast %49 : f32 to vector<8x128xf32>
    %260 = arith.addf %258, %259 : vector<8x128xf32>
    %cst_83 = arith.constant 0.000000e+00 : f32
    %261 = vector.broadcast %cst_83 : f32 to vector<8x128xf32>
    %262 = arith.maximumf %260, %261 : vector<8x128xf32>
    %263 = vector.broadcast %81 : f32 to vector<8x128xf32>
    %264 = arith.mulf %262, %263 : vector<8x128xf32>
    %265 = arith.addf %256, %264 : vector<8x128xf32>
    %266 = vector.broadcast %18 : f32 to vector<8x128xf32>
    %267 = arith.mulf %102, %266 : vector<8x128xf32>
    %268 = vector.broadcast %50 : f32 to vector<8x128xf32>
    %269 = arith.addf %267, %268 : vector<8x128xf32>
    %cst_84 = arith.constant 0.000000e+00 : f32
    %270 = vector.broadcast %cst_84 : f32 to vector<8x128xf32>
    %271 = arith.maximumf %269, %270 : vector<8x128xf32>
    %272 = vector.broadcast %82 : f32 to vector<8x128xf32>
    %273 = arith.mulf %271, %272 : vector<8x128xf32>
    %274 = arith.addf %265, %273 : vector<8x128xf32>
    %275 = vector.broadcast %19 : f32 to vector<8x128xf32>
    %276 = arith.mulf %102, %275 : vector<8x128xf32>
    %277 = vector.broadcast %51 : f32 to vector<8x128xf32>
    %278 = arith.addf %276, %277 : vector<8x128xf32>
    %cst_85 = arith.constant 0.000000e+00 : f32
    %279 = vector.broadcast %cst_85 : f32 to vector<8x128xf32>
    %280 = arith.maximumf %278, %279 : vector<8x128xf32>
    %281 = vector.broadcast %83 : f32 to vector<8x128xf32>
    %282 = arith.mulf %280, %281 : vector<8x128xf32>
    %283 = arith.addf %274, %282 : vector<8x128xf32>
    %284 = vector.broadcast %20 : f32 to vector<8x128xf32>
    %285 = arith.mulf %102, %284 : vector<8x128xf32>
    %286 = vector.broadcast %52 : f32 to vector<8x128xf32>
    %287 = arith.addf %285, %286 : vector<8x128xf32>
    %cst_86 = arith.constant 0.000000e+00 : f32
    %288 = vector.broadcast %cst_86 : f32 to vector<8x128xf32>
    %289 = arith.maximumf %287, %288 : vector<8x128xf32>
    %290 = vector.broadcast %84 : f32 to vector<8x128xf32>
    %291 = arith.mulf %289, %290 : vector<8x128xf32>
    %292 = arith.addf %283, %291 : vector<8x128xf32>
    %293 = vector.broadcast %21 : f32 to vector<8x128xf32>
    %294 = arith.mulf %102, %293 : vector<8x128xf32>
    %295 = vector.broadcast %53 : f32 to vector<8x128xf32>
    %296 = arith.addf %294, %295 : vector<8x128xf32>
    %cst_87 = arith.constant 0.000000e+00 : f32
    %297 = vector.broadcast %cst_87 : f32 to vector<8x128xf32>
    %298 = arith.maximumf %296, %297 : vector<8x128xf32>
    %299 = vector.broadcast %85 : f32 to vector<8x128xf32>
    %300 = arith.mulf %298, %299 : vector<8x128xf32>
    %301 = arith.addf %292, %300 : vector<8x128xf32>
    %302 = vector.broadcast %22 : f32 to vector<8x128xf32>
    %303 = arith.mulf %102, %302 : vector<8x128xf32>
    %304 = vector.broadcast %54 : f32 to vector<8x128xf32>
    %305 = arith.addf %303, %304 : vector<8x128xf32>
    %cst_88 = arith.constant 0.000000e+00 : f32
    %306 = vector.broadcast %cst_88 : f32 to vector<8x128xf32>
    %307 = arith.maximumf %305, %306 : vector<8x128xf32>
    %308 = vector.broadcast %86 : f32 to vector<8x128xf32>
    %309 = arith.mulf %307, %308 : vector<8x128xf32>
    %310 = arith.addf %301, %309 : vector<8x128xf32>
    %311 = vector.broadcast %23 : f32 to vector<8x128xf32>
    %312 = arith.mulf %102, %311 : vector<8x128xf32>
    %313 = vector.broadcast %55 : f32 to vector<8x128xf32>
    %314 = arith.addf %312, %313 : vector<8x128xf32>
    %cst_89 = arith.constant 0.000000e+00 : f32
    %315 = vector.broadcast %cst_89 : f32 to vector<8x128xf32>
    %316 = arith.maximumf %314, %315 : vector<8x128xf32>
    %317 = vector.broadcast %87 : f32 to vector<8x128xf32>
    %318 = arith.mulf %316, %317 : vector<8x128xf32>
    %319 = arith.addf %310, %318 : vector<8x128xf32>
    %320 = vector.broadcast %24 : f32 to vector<8x128xf32>
    %321 = arith.mulf %102, %320 : vector<8x128xf32>
    %322 = vector.broadcast %56 : f32 to vector<8x128xf32>
    %323 = arith.addf %321, %322 : vector<8x128xf32>
    %cst_90 = arith.constant 0.000000e+00 : f32
    %324 = vector.broadcast %cst_90 : f32 to vector<8x128xf32>
    %325 = arith.maximumf %323, %324 : vector<8x128xf32>
    %326 = vector.broadcast %88 : f32 to vector<8x128xf32>
    %327 = arith.mulf %325, %326 : vector<8x128xf32>
    %328 = arith.addf %319, %327 : vector<8x128xf32>
    %329 = vector.broadcast %25 : f32 to vector<8x128xf32>
    %330 = arith.mulf %102, %329 : vector<8x128xf32>
    %331 = vector.broadcast %57 : f32 to vector<8x128xf32>
    %332 = arith.addf %330, %331 : vector<8x128xf32>
    %cst_91 = arith.constant 0.000000e+00 : f32
    %333 = vector.broadcast %cst_91 : f32 to vector<8x128xf32>
    %334 = arith.maximumf %332, %333 : vector<8x128xf32>
    %335 = vector.broadcast %89 : f32 to vector<8x128xf32>
    %336 = arith.mulf %334, %335 : vector<8x128xf32>
    %337 = arith.addf %328, %336 : vector<8x128xf32>
    %338 = vector.broadcast %26 : f32 to vector<8x128xf32>
    %339 = arith.mulf %102, %338 : vector<8x128xf32>
    %340 = vector.broadcast %58 : f32 to vector<8x128xf32>
    %341 = arith.addf %339, %340 : vector<8x128xf32>
    %cst_92 = arith.constant 0.000000e+00 : f32
    %342 = vector.broadcast %cst_92 : f32 to vector<8x128xf32>
    %343 = arith.maximumf %341, %342 : vector<8x128xf32>
    %344 = vector.broadcast %90 : f32 to vector<8x128xf32>
    %345 = arith.mulf %343, %344 : vector<8x128xf32>
    %346 = arith.addf %337, %345 : vector<8x128xf32>
    %347 = vector.broadcast %27 : f32 to vector<8x128xf32>
    %348 = arith.mulf %102, %347 : vector<8x128xf32>
    %349 = vector.broadcast %59 : f32 to vector<8x128xf32>
    %350 = arith.addf %348, %349 : vector<8x128xf32>
    %cst_93 = arith.constant 0.000000e+00 : f32
    %351 = vector.broadcast %cst_93 : f32 to vector<8x128xf32>
    %352 = arith.maximumf %350, %351 : vector<8x128xf32>
    %353 = vector.broadcast %91 : f32 to vector<8x128xf32>
    %354 = arith.mulf %352, %353 : vector<8x128xf32>
    %355 = arith.addf %346, %354 : vector<8x128xf32>
    %356 = vector.broadcast %28 : f32 to vector<8x128xf32>
    %357 = arith.mulf %102, %356 : vector<8x128xf32>
    %358 = vector.broadcast %60 : f32 to vector<8x128xf32>
    %359 = arith.addf %357, %358 : vector<8x128xf32>
    %cst_94 = arith.constant 0.000000e+00 : f32
    %360 = vector.broadcast %cst_94 : f32 to vector<8x128xf32>
    %361 = arith.maximumf %359, %360 : vector<8x128xf32>
    %362 = vector.broadcast %92 : f32 to vector<8x128xf32>
    %363 = arith.mulf %361, %362 : vector<8x128xf32>
    %364 = arith.addf %355, %363 : vector<8x128xf32>
    %365 = vector.broadcast %29 : f32 to vector<8x128xf32>
    %366 = arith.mulf %102, %365 : vector<8x128xf32>
    %367 = vector.broadcast %61 : f32 to vector<8x128xf32>
    %368 = arith.addf %366, %367 : vector<8x128xf32>
    %cst_95 = arith.constant 0.000000e+00 : f32
    %369 = vector.broadcast %cst_95 : f32 to vector<8x128xf32>
    %370 = arith.maximumf %368, %369 : vector<8x128xf32>
    %371 = vector.broadcast %93 : f32 to vector<8x128xf32>
    %372 = arith.mulf %370, %371 : vector<8x128xf32>
    %373 = arith.addf %364, %372 : vector<8x128xf32>
    %374 = vector.broadcast %30 : f32 to vector<8x128xf32>
    %375 = arith.mulf %102, %374 : vector<8x128xf32>
    %376 = vector.broadcast %62 : f32 to vector<8x128xf32>
    %377 = arith.addf %375, %376 : vector<8x128xf32>
    %cst_96 = arith.constant 0.000000e+00 : f32
    %378 = vector.broadcast %cst_96 : f32 to vector<8x128xf32>
    %379 = arith.maximumf %377, %378 : vector<8x128xf32>
    %380 = vector.broadcast %94 : f32 to vector<8x128xf32>
    %381 = arith.mulf %379, %380 : vector<8x128xf32>
    %382 = arith.addf %373, %381 : vector<8x128xf32>
    %383 = vector.broadcast %31 : f32 to vector<8x128xf32>
    %384 = arith.mulf %102, %383 : vector<8x128xf32>
    %385 = vector.broadcast %63 : f32 to vector<8x128xf32>
    %386 = arith.addf %384, %385 : vector<8x128xf32>
    %cst_97 = arith.constant 0.000000e+00 : f32
    %387 = vector.broadcast %cst_97 : f32 to vector<8x128xf32>
    %388 = arith.maximumf %386, %387 : vector<8x128xf32>
    %389 = vector.broadcast %95 : f32 to vector<8x128xf32>
    %390 = arith.mulf %388, %389 : vector<8x128xf32>
    %391 = arith.addf %382, %390 : vector<8x128xf32>
    %392 = arith.index_cast %100 : i32 to index
    %c0_98 = arith.constant 0 : index
    %393 = vector.load %arg6[%392, %c0_98] : memref<8x128xf32, #tpu.memory_space<vmem>>, vector<8x128xf32>
    tpu.vector_store %arg6[%392, %c0_98], %391 {strides = array<i32>} : memref<8x128xf32, #tpu.memory_space<vmem>>, vector<8x128xf32>,
    %c1_i32_99 = arith.constant 1 : i32
    return
  }
  func.func @transform_0(%arg0: i32) -> (i32, i32) {
    %c0_i32 = arith.constant 0 : i32
    %c0_i32_0 = arith.constant 0 : i32
    return %arg0, %c0_i32 : i32, i32
  }
  func.func @transform_1(%arg0: i32) -> i32 {
    %c0_i32 = arith.constant 0 : i32
    %c0_i32_0 = arith.constant 0 : i32
    return %c0_i32 : i32
  }
  func.func @transform_2(%arg0: i32) -> i32 {
    %c0_i32 = arith.constant 0 : i32
    %c0_i32_0 = arith.constant 0 : i32
    return %c0_i32 : i32
  }
  func.func @transform_3(%arg0: i32) -> i32 {
    %c0_i32 = arith.constant 0 : i32
    %c0_i32_0 = arith.constant 0 : i32
    return %c0_i32 : i32
  }
  func.func @transform_4(%arg0: i32) -> i32 {
    %c0_i32 = arith.constant 0 : i32
    %c0_i32_0 = arith.constant 0 : i32
    return %c0_i32 : i32
  }
  func.func @transform_5(%arg0: i32) -> (i32, i32) {
    %c0_i32 = arith.constant 0 : i32
    %c0_i32_0 = arith.constant 0 : i32
    return %arg0, %c0_i32 : i32, i32
  }
}

</mosaic_0001>

<bundles_post_ra>
// kernel: tpu_custom_call.1
= control target key start
LH: loop header
LB: loop body
LE: loop exit
PB: predicated region body
PF: predicated region fallthrough
CT: control target
= control target key end

     0   :  { %s1000_s0 = inlined_call_operand.hbm [shape: f32[8,128], index: 0, kind: input, shape index: {}]   ;;  %s1001_s1 = inlined_call_operand.vmem [shape: f32[32], index: 1, kind: input, shape index: {}]   ;;  %s1002_s2 = inlined_call_operand.vmem [shape: f32[32], index: 2, kind: input, shape index: {}]   ;;  %s1003_s3 = inlined_call_operand.vmem [shape: f32[32], index: 3, kind: input, shape index: {}]   ;;  %s1004_s4 = inlined_call_operand.<no memory space> [shape: f32[1], index: 4, kind: input, shape index: {}]   ;;  %s1005_s5 = inlined_call_operand.hbm [shape: f32[8,128], index: 5, kind: output, shape index: {}]  }
   0x1   :  { %1006 = sst [smem:[#allocation26_spill]] %s1005_s5 }
   0x2   :  { %11 = vsyncpa [#allocation4], 0 }
   0x3   :  { %12 = vsyncpa [#allocation6], 0 }
   0x4   :  { %13 = vsyncpa [#allocation9], 0  ;;  %s40_s20 = sshll.u32 %s1002_s2, 4  ;;  %s41_s20 = int_to_ptr.vmem [resolvable:$true] %s40_s20 }
   0x5   :  { %14 = vsyncpa [#allocation5], 0  ;;  %s20_s23 = sshll.u32 %s1000_s0, 4  ;;  %s637_s24 = smov [#allocation8]   ;;  %s21_s23 = int_to_ptr.hbm [resolvable:$true] %s20_s23 }
   0x6   :  { %43 = dma.vmem_to_smem %s41_s20, 16, %s637_s24, [#allocation9]  }
   0x7   :  { %s638_s25 = smov [#allocation3]   ;;  %s31_s29 = sshll.u32 %s1001_s1, 4  ;;  %s32_s29 = int_to_ptr.vmem [resolvable:$true] %s31_s29 }
   0x8   :  { %s22_s26 = sshll.u32 %s638_s25, 4  ;;  %s49_s6 = sshll.u32 %s1003_s3, 4  ;;  %s23_s26 = int_to_ptr.vmem [resolvable:$true] %s22_s26  ;;  %s50_s6 = int_to_ptr.vmem [resolvable:$true] %s49_s6 }
   0x9   :  { %25 = dma.hbm_to_vmem [thread:$0]  %s21_s23, 128, %s23_s26, [#allocation4]  }
   0xa   :  { %s639_s7 = smov [#allocation7]   ;;  %s640_s0 = smov [#allocation10]  }
   0xb   :  { %34 = dma.vmem_to_smem %s32_s29, 16, %s639_s7, [#allocation6]  }
   0xc   :  { %52 = dma.vmem_to_smem %s50_s6, 16, %s640_s0, [#allocation9]  }
   0xd   :  { %629 = dma.done.wait [#allocation4], 128  }
   0xe   :  { %630 = vsyncadd [#allocation4], 4294967168 }
   0xf   :  { %631 = dma.done.wait [#allocation6], 16  }
  0x10   :  { %632 = vsyncadd [#allocation6], 4294967280 }
  0x11   :  { %633 = dma.done.wait [#allocation9], 32  }
  0x12   :  { %634 = vsyncadd [#allocation9], 4294967264 }
  0x13   :  { %71 = sfence }
  0x14   :  { %s684_s1 = sld [smem:[#allocation7]]  ;;  %v754_v0 = vld [vmem:[#allocation3] sm:$0xff]  ;;  %v177_v29 = vstv %s1004_s4 }
  0x15   :  { %s686_s8 = sld [smem:[#allocation7 + $0x1]] }
  0x16   :  { %s688_s9 = sld [smem:[#allocation7 + $0x2]] }
  0x17   :  { %s690_s10 = sld [smem:[#allocation7 + $0x3]] }
  0x18   :  { %s692_s3 = sld [smem:[#allocation7 + $0x4]] }
  0x19   :  { %s694_s11 = sld [smem:[#allocation7 + $0x5]] }
  0x1a   :  { %s696_s12 = sld [smem:[#allocation7 + $0x6]]  ;;  %v170_v1 = vstv %s684_s1 }
  0x1b   :  { %s698_s13 = sld [smem:[#allocation7 + $0x7]]  ;;  %v179_v2 = vstv %s686_s8  ;;  %v171_v6 = vmul.f32 %v170_v1, %v754_v0 }
  0x1c   :  { %s700_s14 = sld [smem:[#allocation7 + $0x8]]  ;;  %v187_v3 = vstv %s688_s9  ;;  %v180_v8 = vmul.f32 %v179_v2, %v754_v0 }
  0x1d   :  { %s702_s15 = sld [smem:[#allocation7 + $0x9]]  ;;  %v195_v4 = vstv %s690_s10  ;;  %v188_v10 = vmul.f32 %v187_v3, %v754_v0 }
  0x1e   :  { %s704_s16 = sld [smem:[#allocation7 + $0xa]]  ;;  %v203_v5 = vstv %s692_s3  ;;  %v196_v11 = vmul.f32 %v195_v4, %v754_v0 }
  0x1f   :  { %s706_s17 = sld [smem:[#allocation7 + $0xb]]  ;;  %v204_v12 = vmul.f32 %v203_v5, %v754_v0  ;;  %v211_v17 = vstv %s694_s11 }
  0x20   :  { %s708_s18 = sld [smem:[#allocation7 + $0xc]]  ;;  %v219_v18 = vstv %s696_s12  ;;  %v212_v23 = vmul.f32 %v211_v17, %v754_v0 }
  0x21   :  { %s710_s19 = sld [smem:[#allocation7 + $0xd]]  ;;  %v220_v24 = vmul.f32 %v219_v18, %v754_v0  ;;  %v227_v28 = vstv %s698_s13 }
  0x22   :  { %s712_s20 = sld [smem:[#allocation7 + $0xe]]  ;;  %v235_v34 = vstv %s700_s14  ;;  %v228_v38 = vmul.f32 %v227_v28, %v754_v0 }
  0x23   :  { %s714_s21 = sld [smem:[#allocation7 + $0xf]]  ;;  %v243_v42 = vstv %s702_s15  ;;  %v236_v45 = vmul.f32 %v235_v34, %v754_v0 }
  0x24   :  { %s716_s22 = sld [smem:[#allocation7 + $0x10]]  ;;  %v251_v50 = vstv %s704_s16  ;;  %v244_v54 = vmul.f32 %v243_v42, %v754_v0 }
  0x25   :  { %s718_s23 = sld [smem:[#allocation7 + $0x11]]  ;;  %v259_v58 = vstv %s706_s17  ;;  %v252_v62 = vmul.f32 %v251_v50, %v754_v0 }
  0x26   :  { %s720_s24 = sld [smem:[#allocation7 + $0x12]]  ;;  %v267_v3 = vstv %s708_s18 }
  0x27   :  { %s722_s25 = sld [smem:[#allocation7 + $0x13]] }
  0x28   :  { %s724_s26 = sld [smem:[#allocation7 + $0x14]] }
  0x29   :  { %s726_s27 = sld [smem:[#allocation7 + $0x15]] }
  0x2a   :  { %s728_s28 = sld [smem:[#allocation7 + $0x16]] }
  0x2b   :  { %s730_s29 = sld [smem:[#allocation7 + $0x17]] }
  0x2c   :  { %s732_s30 = sld [smem:[#allocation7 + $0x18]] }
  0x2d   :  { %s734_s2 = sld [smem:[#allocation7 + $0x19]] }
  0x2e   :  { %1007 = sst [smem:[#allocation16_spill]] %s724_s26 }
  0x2f   :  { %1008 = sst [smem:[#allocation17_spill]] %s726_s27 }
  0x30   :  { %1009 = sst [smem:[#allocation18_spill]] %s728_s28 }
  0x31   :  { %1010 = sst [smem:[#allocation19_spill]] %s730_s29 }
  0x32   :  { %1011 = sst [smem:[#allocation20_spill]] %s732_s30 }
  0x33   :  { %1012 = sst [smem:[#allocation21_spill]] %s734_s2 }
  0x34   :  { %s736_s6 = sld [smem:[#allocation7 + $0x1a]] }
  0x35   :  { %s738_s7 = sld [smem:[#allocation7 + $0x1b]] }
  0x36   :  { %s740_s0 = sld [smem:[#allocation7 + $0x1c]] }
  0x37   :  { %s104_s5 = sld [smem:[#allocation8]] }
  0x38   :  { %s742_s27 = sld [smem:[#allocation8 + $0x1]] }
  0x39   :  { %s744_s28 = sld [smem:[#allocation8 + $0x2]] }
  0x3a   :  { %1013 = sst [smem:[#allocation22_spill]] %s736_s6 }
  0x3b   :  { %1014 = sst [smem:[#allocation23_spill]] %s738_s7 }
  0x3c   :  { %1015 = sst [smem:[#allocation24_spill]] %s740_s0 }
  0x3d   :  { %s746_s29 = sld [smem:[#allocation8 + $0x3]]  ;;  %v172_v7 = vstv %s104_s5 }
  0x3e   :  { %s748_s26 = sld [smem:[#allocation8 + $0x4]]  ;;  %v181_v9 = vstv %s742_s27  ;;  %v173_v16 = vadd.f32 %v172_v7, %v171_v6  ;;  %v260_v7 = vmul.f32 %v259_v58, %v754_v0 }
  0x3f   :  { %s750_s30 = sld [smem:[#allocation7 + $0x1d]]  ;;  %v189_v13 = vstv %s744_s28  ;;  %v182_v19 = vadd.f32 %v181_v9, %v180_v8 }
  0x40   :  { %s752_s2 = sld [smem:[#allocation7 + $0x1e]]  ;;  %v190_v20 = vadd.f32 %v189_v13, %v188_v10  ;;  %v174_v25 = vmax.f32 %v173_v16, 0.0 }
  0x41   :  { %s757_s7 = sld [smem:[#allocation7 + $0x1f]]  ;;  %v183_v30 = vmax.f32 %v182_v19, 0.0  ;;  %v283_v19 = vstv %s712_s20 }
  0x42   :  { %s760_s0 = sld [smem:[#allocation8 + $0x5]]  ;;  %v191_v31 = vmax.f32 %v190_v20, 0.0 }
  0x43   :  { %s765_s6 = sld [smem:[#allocation8 + $0x6]]  ;;  %v197_v14 = vstv %s746_s29 }
  0x44   :  { %s771_s1 = sld [smem:[#allocation8 + $0x8]]  ;;  %v205_v15 = vstv %s748_s26  ;;  %v198_v21 = vadd.f32 %v197_v14, %v196_v11  ;;  %v275_v11 = vstv %s710_s19 }
  0x45   :  { %s777_s8 = sld [smem:[#allocation8 + $0x9]]  ;;  %v206_v22 = vadd.f32 %v205_v15, %v204_v12  ;;  %v268_v15 = vmul.f32 %v267_v3, %v754_v0 }
  0x46   :  { %1016 = sst [smem:[#allocation25_spill]] %s752_s2  ;;  %v199_v32 = vmax.f32 %v198_v21, 0.0 }
  0x47   :  { %s768_s2 = sld [smem:[#allocation8 + $0x7]]  ;;  %v207_v33 = vmax.f32 %v206_v22, 0.0 }
  0x48   :  { %s782_s9 = sld [smem:[#allocation8 + $0xa]]  ;;  %v213_v26 = vstv %s760_s0 }
  0x49   :  { %s136_s5 = sld [smem:[#allocation10]]  ;;  %v221_v27 = vstv %s765_s6  ;;  %v214_v36 = vadd.f32 %v213_v26, %v212_v23  ;;  %v276_v23 = vmul.f32 %v275_v11, %v754_v0 }
  0x4a   :  { %s786_s10 = sld [smem:[#allocation10 + $0x1]]  ;;  %v222_v37 = vadd.f32 %v221_v27, %v220_v24  ;;  %v237_v46 = vstv %s771_s1  ;;  %v291_v27 = vstv %s714_s21 }
  0x4b   :  { %s788_s3 = sld [smem:[#allocation10 + $0x2]]  ;;  %v215_v52 = vmax.f32 %v214_v36, 0.0  ;;  %v245_v57 = vstv %s777_s8  ;;  %v238_v61 = vadd.f32 %v237_v46, %v236_v45 }
  0x4c   :  { %s792_s26 = sld [smem:[#allocation10 + $0x3]]  ;;  %v223_v60 = vmax.f32 %v222_v37, 0.0  ;;  %v246_v6 = vadd.f32 %v245_v57, %v244_v54 }
  0x4d   :  { %s797_s11 = sld [smem:[#allocation10 + $0x4]]  ;;  %v229_v41 = vstv %s768_s2  ;;  %v239_v13 = vmax.f32 %v238_v61, 0.0 }
  0x4e   :  { %s802_s28 = sld [smem:[#allocation10 + $0x5]]  ;;  %v230_v53 = vadd.f32 %v229_v41, %v228_v38  ;;  %v253_v2 = vstv %s782_s9  ;;  %v247_v21 = vmax.f32 %v246_v6, 0.0 }
  0x4f   :  { %s805_s29 = sld [smem:[#allocation10 + $0x6]]  ;;  %v175_v35 = vstv %s136_s5  ;;  %v254_v14 = vadd.f32 %v253_v2, %v252_v62 }
  0x50   :  { %s808_s4 = sld [smem:[#allocation8 + $0xb]]  ;;  %v176_v39 = vmul.f32 %v175_v35, %v174_v25  ;;  %v184_v40 = vstv %s786_s10  ;;  %v231_v5 = vmax.f32 %v230_v53, 0.0  ;;  %v299_v35 = vstv %s716_s22 }
  0x51   :  { %s813_s13 = sld [smem:[#allocation10 + $0x7]]  ;;  %v185_v43 = vmul.f32 %v184_v40, %v183_v30  ;;  %v192_v44 = vstv %s788_s3 }
  0x52   :  { %s818_s14 = sld [smem:[#allocation8 + $0xc]]  ;;  %v178_v47 = vadd.f32 %v177_v29, %v176_v39  ;;  %v193_v48 = vmul.f32 %v192_v44, %v191_v31  ;;  %v200_v49 = vstv %s792_s26  ;;  %v255_v29 = vmax.f32 %v254_v14, 0.0 }
  0x53   :  { %s822_s6 = sld [smem:[#allocation10 + $0x8]]  ;;  %v208_v51 = vstv %s797_s11  ;;  %v201_v56 = vmul.f32 %v200_v49, %v199_v32  ;;  %v284_v31 = vmul.f32 %v283_v19, %v754_v0  ;;  %v292_v39 = vmul.f32 %v291_v27, %v754_v0 }
  0x54   :  { %s826_s15 = sld [smem:[#allocation8 + $0xd]]  ;;  %v186_v55 = vadd.f32 %v185_v43, %v178_v47  ;;  %v216_v59 = vstv %s802_s28  ;;  %v209_v1 = vmul.f32 %v208_v51, %v207_v33  ;;  %v307_v43 = vstv %s718_s23 }
  0x55   :  { %s830_s2 = sld [smem:[#allocation10 + $0x9]]  ;;  %v224_v4 = vstv %s805_s29  ;;  %v217_v9 = vmul.f32 %v216_v59, %v215_v52  ;;  %v300_v47 = vmul.f32 %v299_v35, %v754_v0  ;;  %v315_v51 = vstv %s720_s24 }
  0x56   :  { %s834_s16 = sld [smem:[#allocation8 + $0xe]]  ;;  %v194_v63 = vadd.f32 %v193_v48, %v186_v55  ;;  %v261_v10 = vstv %s808_s4  ;;  %v225_v17 = vmul.f32 %v224_v4, %v223_v60  ;;  %v308_v55 = vmul.f32 %v307_v43, %v754_v0 }
  0x57   :  { %s838_s0 = sld [smem:[#allocation10 + $0xa]]  ;;  %v232_v12 = vstv %s813_s13  ;;  %v262_v22 = vadd.f32 %v261_v10, %v260_v7  ;;  %v323_v59 = vstv %s722_s25 }
  0x58   :  { %s842_s17 = sld [smem:[#allocation8 + $0xf]]  ;;  %v202_v8 = vadd.f32 %v201_v56, %v194_v63  ;;  %v269_v18 = vstv %s818_s14  ;;  %v233_v25 = vmul.f32 %v232_v12, %v231_v5  ;;  %v316_v63 = vmul.f32 %v315_v51, %v754_v0 }
  0x59   :  { %s846_s1 = sld [smem:[#allocation10 + $0xb]]  ;;  %v240_v20 = vstv %s822_s6  ;;  %v270_v30 = vadd.f32 %v269_v18, %v268_v15  ;;  %v263_v37 = vmax.f32 %v262_v22, 0.0 }
  0x5a   :  { %s850_s18 = sld [smem:[#allocation8 + $0x10]]  ;;  %v210_v16 = vadd.f32 %v209_v1, %v202_v8  ;;  %v277_v26 = vstv %s826_s15  ;;  %v241_v33 = vmul.f32 %v240_v20, %v239_v13  ;;  %v324_v8 = vmul.f32 %v323_v59, %v754_v0 }
  0x5b   :  { %s854_s8 = sld [smem:[#allocation10 + $0xc]]  ;;  %v248_v28 = vstv %s830_s2  ;;  %v278_v38 = vadd.f32 %v277_v26, %v276_v23  ;;  %v271_v45 = vmax.f32 %v270_v30, 0.0 }
  0x5c   :  { %s858_s19 = sld [smem:[#allocation8 + $0x11]]  ;;  %v218_v24 = vadd.f32 %v217_v9, %v210_v16  ;;  %v285_v34 = vstv %s834_s16  ;;  %v249_v41 = vmul.f32 %v248_v28, %v247_v21 }
  0x5d   :  { %s862_s9 = sld [smem:[#allocation10 + $0xd]]  ;;  %v256_v36 = vstv %s838_s0  ;;  %v286_v46 = vadd.f32 %v285_v34, %v284_v31  ;;  %v279_v53 = vmax.f32 %v278_v38, 0.0 }
  0x5e   :  { %s866_s20 = sld [smem:[#allocation8 + $0x12]]  ;;  %v226_v32 = vadd.f32 %v225_v17, %v218_v24  ;;  %v293_v42 = vstv %s842_s17  ;;  %v257_v49 = vmul.f32 %v256_v36, %v255_v29 }
  0x5f   :  { %s870_s5 = sld [smem:[#allocation10 + $0xe]]  ;;  %v264_v44 = vstv %s846_s1  ;;  %v294_v54 = vadd.f32 %v293_v42, %v292_v39  ;;  %v287_v61 = vmax.f32 %v286_v46, 0.0 }
  0x60   :  { %s874_s21 = sld [smem:[#allocation8 + $0x13]]  ;;  %v234_v40 = vadd.f32 %v233_v25, %v226_v32  ;;  %v301_v50 = vstv %s850_s18  ;;  %v265_v57 = vmul.f32 %v264_v44, %v263_v37 }
  0x61   :  { %s878_s10 = sld [smem:[#allocation10 + $0xf]]  ;;  %v272_v52 = vstv %s854_s8  ;;  %v302_v62 = vadd.f32 %v301_v50, %v300_v47  ;;  %v295_v6 = vmax.f32 %v294_v54, 0.0 }
  0x62   :  { %s882_s22 = sld [smem:[#allocation8 + $0x14]]  ;;  %v242_v48 = vadd.f32 %v241_v33, %v234_v40  ;;  %v309_v58 = vstv %s858_s19  ;;  %v273_v2 = vmul.f32 %v272_v52, %v271_v45 }
  0x63   :  { %s886_s3 = sld [smem:[#allocation10 + $0x10]]  ;;  %v280_v60 = vstv %s862_s9  ;;  %v310_v7 = vadd.f32 %v309_v58, %v308_v55  ;;  %v303_v14 = vmax.f32 %v302_v62, 0.0 }
  0x64   :  { %s1017_s23 = sld [smem:[#allocation16_spill]]  ;;  %v250_v56 = vadd.f32 %v249_v41, %v242_v48  ;;  %v317_v3 = vstv %s866_s20  ;;  %v281_v10 = vmul.f32 %v280_v60, %v279_v53 }
  0x65   :  { %s890_s26 = sld [smem:[#allocation8 + $0x15]]  ;;  %v288_v5 = vstv %s870_s5  ;;  %v318_v15 = vadd.f32 %v317_v3, %v316_v63  ;;  %v311_v22 = vmax.f32 %v310_v7, 0.0 }
  0x66   :  { %s894_s11 = sld [smem:[#allocation10 + $0x11]]  ;;  %v258_v1 = vadd.f32 %v257_v49, %v250_v56  ;;  %v325_v11 = vstv %s874_s21  ;;  %v289_v18 = vmul.f32 %v288_v5, %v287_v61 }
  0x67   :  { %s1018_s24 = sld [smem:[#allocation17_spill]]  ;;  %v296_v13 = vstv %s878_s10  ;;  %v326_v23 = vadd.f32 %v325_v11, %v324_v8  ;;  %v319_v30 = vmax.f32 %v318_v15, 0.0 }
  0x68   :  { %s898_s12 = sld [smem:[#allocation8 + $0x16]]  ;;  %v266_v9 = vadd.f32 %v265_v57, %v258_v1  ;;  %v333_v19 = vstv %s882_s22  ;;  %v297_v26 = vmul.f32 %v296_v13, %v295_v6 }
  0x69   :  { %s902_s27 = sld [smem:[#allocation10 + $0x12]]  ;;  %v304_v21 = vstv %s886_s3  ;;  %v327_v38 = vmax.f32 %v326_v23, 0.0 }
  0x6a   :  { %v331_v4 = vstv %s1017_s23  ;;  %s1019_s25 = sld [smem:[#allocation18_spill]]  ;;  %v274_v17 = vadd.f32 %v273_v2, %v266_v9  ;;  %v305_v34 = vmul.f32 %v304_v21, %v303_v14 }
  0x6b   :  { %s906_s28 = sld [smem:[#allocation8 + $0x17]]  ;;  %v332_v16 = vmul.f32 %v331_v4, %v754_v0  ;;  %v341_v27 = vstv %s890_s26 }
  0x6c   :  { %s910_s29 = sld [smem:[#allocation10 + $0x13]]  ;;  %v282_v25 = vadd.f32 %v281_v10, %v274_v17  ;;  %v312_v29 = vstv %s894_s11 }
  0x6d   :  { %v339_v12 = vstv %s1018_s24  ;;  %s1020_s4 = sld [smem:[#allocation19_spill]]  ;;  %v334_v31 = vadd.f32 %v333_v19, %v332_v16  ;;  %v313_v42 = vmul.f32 %v312_v29, %v311_v22  ;;  %v403_v16 = vstv %s750_s30 }
  0x6e   :  { %s914_s13 = sld [smem:[#allocation8 + $0x18]]  ;;  %v340_v24 = vmul.f32 %v339_v12, %v754_v0  ;;  %v290_v33 = vadd.f32 %v289_v18, %v282_v25  ;;  %v349_v35 = vstv %s898_s12 }
  0x6f   :  { %s918_s14 = sld [smem:[#allocation10 + $0x14]]  ;;  %v320_v37 = vstv %s902_s27  ;;  %v335_v50 = vmax.f32 %v334_v31, 0.0  ;;  %v419_v31 = vstv %s757_s7  ;;  %s641_s7 = smov [#allocation11]  }
  0x70   :  { %v347_v20 = vstv %s1019_s25  ;;  %s1021_s6 = sld [smem:[#allocation20_spill]]  ;;  %v342_v39 = vadd.f32 %v341_v27, %v340_v24  ;;  %v298_v41 = vadd.f32 %v297_v26, %v290_v33  ;;  %v321_v49 = vmul.f32 %v320_v37, %v319_v30  ;;  %s433_s25 = sshll.u32 %s641_s7, 4  ;;  %s434_s25 = int_to_ptr.vmem [resolvable:$true] %s433_s25 }
  0x71   :  { %s922_s15 = sld [smem:[#allocation8 + $0x19]]  ;;  %v348_v32 = vmul.f32 %v347_v20, %v754_v0  ;;  %v357_v43 = vstv %s906_s28 }
  0x72   :  { %s926_s2 = sld [smem:[#allocation10 + $0x15]]  ;;  %v328_v45 = vstv %s910_s29  ;;  %v306_v48 = vadd.f32 %v305_v34, %v298_v41  ;;  %v343_v58 = vmax.f32 %v342_v39, 0.0 }
  0x73   :  { %v355_v28 = vstv %s1020_s4  ;;  %s1022_s16 = sld [smem:[#allocation21_spill]]  ;;  %v350_v46 = vadd.f32 %v349_v35, %v348_v32  ;;  %v329_v57 = vmul.f32 %v328_v45, %v327_v38 }
  0x74   :  { %s930_s0 = sld [smem:[#allocation10 + $0x16]]  ;;  %v356_v40 = vmul.f32 %v355_v28, %v754_v0  ;;  %v365_v51 = vstv %s914_s13  ;;  %v314_v56 = vadd.f32 %v313_v42, %v306_v48  ;;  %v404_v28 = vmul.f32 %v403_v16, %v754_v0 }
  0x75   :  { %s934_s17 = sld [smem:[#allocation8 + $0x1a]]  ;;  %v336_v52 = vstv %s918_s14  ;;  %v351_v61 = vmax.f32 %v350_v46, 0.0  ;;  %v420_v42 = vmul.f32 %v419_v31, %v754_v0 }
  0x76   :  { %v363_v36 = vstv %s1021_s6  ;;  %s938_s1 = sld [smem:[#allocation10 + $0x17]]  ;;  %v358_v53 = vadd.f32 %v357_v43, %v356_v40  ;;  %v322_v1 = vadd.f32 %v321_v49, %v314_v56  ;;  %v337_v2 = vmul.f32 %v336_v52, %v335_v50 }
  0x77   :  { %s1023_s18 = sld [smem:[#allocation22_spill]]  ;;  %v364_v47 = vmul.f32 %v363_v36, %v754_v0  ;;  %v373_v59 = vstv %s922_s15 }
  0x78   :  { %s942_s8 = sld [smem:[#allocation8 + $0x1b]]  ;;  %v344_v60 = vstv %s926_s2  ;;  %v359_v5 = vmax.f32 %v358_v53, 0.0  ;;  %v330_v9 = vadd.f32 %v329_v57, %v322_v1 }
  0x79   :  { %v371_v44 = vstv %s1022_s16  ;;  %s946_s19 = sld [smem:[#allocation10 + $0x18]]  ;;  %v366_v62 = vadd.f32 %v365_v51, %v364_v47  ;;  %v345_v10 = vmul.f32 %v344_v60, %v343_v58 }
  0x7a   :  { %s1024_s9 = sld [smem:[#allocation23_spill]]  ;;  %v372_v54 = vmul.f32 %v371_v44, %v754_v0  ;;  %v352_v3 = vstv %s930_s0  ;;  %v338_v17 = vadd.f32 %v337_v2, %v330_v9 }
  0x7b   :  { %s949_s20 = sld [smem:[#allocation8 + $0x1c]]  ;;  %v381_v7 = vstv %s934_s17  ;;  %v353_v13 = vmul.f32 %v352_v3, %v351_v61  ;;  %v367_v14 = vmax.f32 %v366_v62, 0.0 }
  0x7c   :  { %s954_s5 = sld [smem:[#allocation10 + $0x19]]  ;;  %v374_v6 = vadd.f32 %v373_v59, %v372_v54  ;;  %v360_v11 = vstv %s938_s1  ;;  %v346_v25 = vadd.f32 %v345_v10, %v338_v17 }
  0x7d   :  { %v379_v55 = vstv %s1023_s18  ;;  %s1025_s21 = sld [smem:[#allocation24_spill]]  ;;  %v361_v21 = vmul.f32 %v360_v11, %v359_v5 }
  0x7e   :  { %s957_s10 = sld [smem:[#allocation8 + $0x1d]]  ;;  %v380_v4 = vmul.f32 %v379_v55, %v754_v0  ;;  %v389_v15 = vstv %s942_s8  ;;  %v375_v22 = vmax.f32 %v374_v6, 0.0  ;;  %v354_v32 = vadd.f32 %v353_v13, %v346_v25 }
  0x7f   :  { %s961_s22 = sld [smem:[#allocation8 + $0x1e]]  ;;  %v368_v18 = vstv %s946_s19 }
  0x80   :  { %v387_v63 = vstv %s1024_s9  ;;  %s965_s3 = sld [smem:[#allocation10 + $0x1a]]  ;;  %v382_v19 = vadd.f32 %v381_v7, %v380_v4  ;;  %v369_v29 = vmul.f32 %v368_v18, %v367_v14  ;;  %v362_v39 = vadd.f32 %v361_v21, %v354_v32 }
  0x81   :  { %s969_s23 = sld [smem:[#allocation8 + $0x1f]]  ;;  %v388_v12 = vmul.f32 %v387_v63, %v754_v0  ;;  %v397_v23 = vstv %s949_s20 }
  0x82   :  { %s1026_s26 = sld [smem:[#allocation25_spill]]  ;;  %v376_v26 = vstv %s954_s5  ;;  %v383_v33 = vmax.f32 %v382_v19, 0.0  ;;  %v370_v45 = vadd.f32 %v369_v29, %v362_v39 }
  0x83   :  { %v395_v8 = vstv %s1025_s21  ;;  %s973_s11 = sld [smem:[#allocation10 + $0x1b]]  ;;  %v390_v27 = vadd.f32 %v389_v15, %v388_v12  ;;  %v377_v36 = vmul.f32 %v376_v26, %v375_v22 }
  0x84   :  { %v396_v20 = vmul.f32 %v395_v8, %v754_v0  ;;  %s979_s24 = sld [smem:[#allocation10 + $0x1c]]  ;;  %v405_v30 = vstv %s957_s10 }
  0x85   :  { %s985_s30 = sld [smem:[#allocation10 + $0x1d]]  ;;  %v413_v38 = vstv %s961_s22  ;;  %v391_v40 = vmax.f32 %v390_v27, 0.0  ;;  %v406_v41 = vadd.f32 %v405_v30, %v404_v28  ;;  %v378_v50 = vadd.f32 %v377_v36, %v370_v45 }
  0x86   :  { %v398_v34 = vadd.f32 %v397_v23, %v396_v20  ;;  %s538_s12 = sld [smem:[#allocation10 + $0x1e]]  ;;  %v384_v37 = vstv %s965_s3 }
  0x87   :  { %s539_s27 = sld [smem:[#allocation10 + $0x1f]]  ;;  %v421_v44 = vstv %s969_s23  ;;  %v385_v46 = vmul.f32 %v384_v37, %v383_v33  ;;  %v407_v52 = vmax.f32 %v406_v41, 0.0 }
  0x88   :  { %v411_v24 = vstv %s1026_s26  ;;  %v399_v47 = vmax.f32 %v398_v34, 0.0  ;;  %v422_v53 = vadd.f32 %v421_v44, %v420_v42  ;;  %s1027_s4 = sld [smem:[#allocation26_spill]] }
  0x89   :  { %v412_v35 = vmul.f32 %v411_v24, %v754_v0  ;;  %v392_v43 = vstv %s973_s11  ;;  %v386_v55 = vadd.f32 %v385_v46, %v378_v50 }
  0x8a   :  { %v400_v49 = vstv %s979_s24  ;;  %v393_v51 = vmul.f32 %v392_v43, %v391_v40  ;;  %v423_v0 = vmax.f32 %v422_v53, 0.0 }
  0x8b   :  { %v414_v48 = vadd.f32 %v413_v38, %v412_v35  ;;  %v408_v54 = vstv %s985_s30  ;;  %v401_v56 = vmul.f32 %v400_v49, %v399_v47 }
  0x8c   :  { %v416_v58 = vstv %s538_s12  ;;  %v394_v59 = vadd.f32 %v393_v51, %v386_v55  ;;  %v409_v60 = vmul.f32 %v408_v54, %v407_v52 }
  0x8d   :  { %v415_v57 = vmax.f32 %v414_v48, 0.0  ;;  %v424_v61 = vstv %s539_s27 }
  0x8e   :  { %v402_v62 = vadd.f32 %v401_v56, %v394_v59  ;;  %v425_v2 = vmul.f32 %v424_v61, %v423_v0  ;;  %s435_s13 = sshll.u32 %s1027_s4, 4  ;;  %s436_s13 = int_to_ptr.hbm [resolvable:$true] %s435_s13 }
  0x8f   :  { %v417_v63 = vmul.f32 %v416_v58, %v415_v57 }
  0x90   :  { %v410_v1 = vadd.f32 %v409_v60, %v402_v62 }
  0x92   :  { %v418_v3 = vadd.f32 %v417_v63, %v410_v1 }
  0x94   :  { %v426_v4 = vadd.f32 %v425_v2, %v418_v3 }
  0x96   :  { %427 = vst [vmem:[#allocation11] sm:$0xff] %v426_v4 }
  0x97   :  { %438 = dma.vmem_to_hbm [thread:$0]  %s434_s25, 128, %s436_s13, [#allocation5]  }
  0x98   :  { %635 = dma.done.wait [#allocation5], 128  }
  0x99   :  { %636 = vsyncadd [#allocation5], 4294967168 }
  0x9a   :  { %443 = vsyncpa [#allocation4], 1 }
  0x9b   :  { %444 = vsyncpa [#allocation5], 1 }
  0x9c   :  { %445 = vsyncpa [#allocation6], 1 }
  0x9d   :  { %446 = vsyncpa [#allocation9], 1 }

</bundles_post_ra>
